<compile_context>
chip_gen: v6e
topology: v6e:2x2x1
jax: 0.10.0
libtpu: 0.0.40
codegen_flags: <defaults>
</compile_context>

<pallas_src>
import functools

import jax
import jax.numpy as jnp
from jax.experimental import pallas as pl
from jax.experimental.pallas import tpu as pltpu


def _mlp_kernel(x_ref, w1_ref, b1_ref, w2_ref, b2_ref,
                w3_ref, b3_ref, w4_ref, b4_ref, o_ref):
    """One batch tile: 4 matmuls + ReLUs + exact softmax, all VMEM-resident."""
    cdt = w1_ref.dtype                      # matmul operand dtype (bf16 or f32)

    # In-kernel cast: x streamed as f32 (4 B/elem, single HBM pass); VPU cast
    # to the MXU dtype is hidden under the pipeline.
    x = x_ref[...].astype(cdt)

    # Layer 1: D -> 256, ReLU  (dominant matmul; f32 accumulation)
    h = jnp.dot(x, w1_ref[...], preferred_element_type=jnp.float32) + b1_ref[...]
    h = jnp.maximum(h, 0.0)

    # Layer 2: 256 -> 64, ReLU
    h = jnp.dot(h.astype(w2_ref.dtype), w2_ref[...],
                preferred_element_type=jnp.float32) + b2_ref[...]
    h = jnp.maximum(h, 0.0)

    # Layer 3: 64 -> 16, ReLU
    h = jnp.dot(h.astype(w3_ref.dtype), w3_ref[...],
                preferred_element_type=jnp.float32) + b3_ref[...]
    h = jnp.maximum(h, 0.0)

    # Layer 4: 16 -> output_size (logits)
    logits = jnp.dot(h.astype(w4_ref.dtype), w4_ref[...],
                     preferred_element_type=jnp.float32) + b4_ref[...]

    # Softmax over dim=1.  Exact division for normalization (tiny (tb, out)
    # tensor) so rows sum to 1.0 to f32 rounding.
    m = jnp.max(logits, axis=-1, keepdims=True)
    e = jnp.exp(logits - m)
    s = jnp.sum(e, axis=-1, keepdims=True)
    o_ref[...] = (e / s).astype(o_ref.dtype)


def _resident_spec(arr):
    """Full-extent block, constant index map -> DMA'd once, stays in VMEM."""
    zeros = (0,) * arr.ndim
    return pl.BlockSpec(arr.shape, lambda i, _z=zeros: _z)


def _pick_batch_tile(B, block_b):
    """Batch-tile size.

    - Small batches: one full-extent block (always a legal block shape).
    - Larger batches: >= 2 roughly equal, 8-row-aligned blocks so the v7x
      megacore 'parallel' axis gets balanced work, capped at block_b to bound
      VMEM.  The grid is cdiv(B, tb); any final partial block is handled by
      Pallas bounds masking (rows are independent).
    """
    if B <= 256:
        return B
    half = -(-B // 2)                 # ceil(B / 2)
    tb = -(-half // 8) * 8            # round up to sublane multiple
    return min(tb, block_b)


@functools.partial(jax.jit,
                   static_argnames=("output_size", "compute_dtype", "block_b"))
def multiple_mlp_forward(x_nchw, params, output_size=2,
                         compute_dtype=jnp.bfloat16, block_b=1024):
    """x_nchw: [B, C, H, W]. params: (in,out) weights, (1,out) biases (f32)."""
    B = x_nchw.shape[0]
    x2d = x_nchw.reshape(B, -1)                        # nn.Flatten (no copy)
    if x2d.dtype != jnp.float32:
        x2d = x2d.astype(jnp.float32)                  # keep HBM stream f32
    D = x2d.shape[1]

    tb = _pick_batch_tile(B, block_b)
    n_blocks = pl.cdiv(B, tb)                          # partial last block OK

    # Small resident weights pre-cast to the MXU dtype; biases/elementwise f32.
    w1 = params["w1"].astype(compute_dtype)
    w2 = params["w2"].astype(compute_dtype)
    w3 = params["w3"].astype(compute_dtype)
    w4 = params["w4"].astype(compute_dtype)
    b1, b2, b3, b4 = params["b1"], params["b2"], params["b3"], params["b4"]

    in_specs = [
        pl.BlockSpec((tb, D), lambda i: (i, 0)),       # streamed x tile
        _resident_spec(w1), _resident_spec(b1),
        _resident_spec(w2), _resident_spec(b2),
        _resident_spec(w3), _resident_spec(b3),
        _resident_spec(w4), _resident_spec(b4),
    ]
    out_spec = pl.BlockSpec((tb, output_size), lambda i: (i, 0))

    out = pl.pallas_call(
        _mlp_kernel,
        out_shape=jax.ShapeDtypeStruct((B, output_size), jnp.float32),
        grid=(n_blocks,),
        in_specs=in_specs,
        out_specs=out_spec,
        compiler_params=pltpu.CompilerParams(
            dimension_semantics=("parallel",),         # megacore on v7x
            vmem_limit_bytes=48 * 1024 * 1024,         # headroom; < v7x 64 MiB
        ),
    )(x2d, w1, b1, w2, b2, w3, b3, w4, b4)

    return out


def init_params(key, input_size, output_size=2):
    """nn.Linear-style init (uniform +-1/sqrt(fan_in)).

    Weights stored as (in_features, out_features) so the kernel computes x @ W
    directly (transpose of nn.Linear.weight). Biases are (1, out), f32.
    """
    dims = [input_size, 256, 64, 16, output_size]
    params = {}
    for i in range(4):
        fan_in, fan_out = dims[i], dims[i + 1]
        key, kw, kb = jax.random.split(key, 3)
        bound = 1.0 / (fan_in ** 0.5)
        params[f"w{i+1}"] = jax.random.uniform(
            kw, (fan_in, fan_out), jnp.float32, -bound, bound)
        params[f"b{i+1}"] = jax.random.uniform(
            kb, (1, fan_out), jnp.float32, -bound, bound)
    return params


def reference_forward(x_nchw, params):
    """Plain-JAX f32 reference for correctness check."""
    B = x_nchw.shape[0]
    h = x_nchw.reshape(B, -1)
    h = jnp.maximum(h @ params["w1"] + params["b1"], 0.0)
    h = jnp.maximum(h @ params["w2"] + params["b2"], 0.0)
    h = jnp.maximum(h @ params["w3"] + params["b3"], 0.0)
    logits = h @ params["w4"] + params["b4"]
    return jax.nn.softmax(logits, axis=-1)


if __name__ == "__main__":
    key = jax.random.PRNGKey(0)
    k_x, k_p, k_x2, k_x3 = jax.random.split(key, 4)

    # Small NCHW input: batch=2, channels=4, spatial=16x16 -> input_size=1024
    B, C, H, W = 2, 4, 16, 16
    input_size = C * H * W
    output_size = 2

    x = jax.random.normal(k_x, (B, C, H, W), jnp.float32)
    params = init_params(k_p, input_size, output_size)

    # 1) f32 matmul path, single full-batch block
    out = jax.block_until_ready(
        multiple_mlp_forward(x, params, output_size=output_size,
                             compute_dtype=jnp.float32))
    ref = reference_forward(x, params)
    assert out.shape == (B, output_size), out.shape
    assert jnp.allclose(out, ref, atol=5e-3, rtol=5e-3)
    assert jnp.allclose(jnp.sum(out, axis=-1), 1.0, atol=1e-3)

    # 2) default bf16-MXU path, larger batch -> two equal 320-row blocks
    B2 = 640
    x2 = jax.random.normal(k_x2, (B2, C, H, W), jnp.float32)
    out2 = jax.block_until_ready(
        multiple_mlp_forward(x2, params, output_size=output_size))
    ref2 = reference_forward(x2, params)
    assert out2.shape == (B2, output_size), out2.shape
    assert jnp.allclose(out2, ref2, atol=5e-2, rtol=5e-2)
    assert jnp.allclose(jnp.sum(out2, axis=-1), 1.0, atol=1e-3)

    # 3) non-divisible batch -> exercises the final partial block (no jnp.pad)
    B3 = 700
    x3 = jax.random.normal(k_x3, (B3, C, H, W), jnp.float32)
    out3 = jax.block_until_ready(
        multiple_mlp_forward(x3, params, output_size=output_size,
                             block_b=256))
    ref3 = reference_forward(x3, params)
    assert out3.shape == (B3, output_size), out3.shape
    assert jnp.allclose(out3, ref3, atol=5e-2, rtol=5e-2)
    assert jnp.allclose(jnp.sum(out3, axis=-1), 1.0, atol=1e-3)

    print("KERNEL_OK")
</pallas_src>

<mosaic_0001>
module attributes {stable_mosaic.version = 11 : i64} {
  func.func @_mlp_kernel(%arg0: i32, %arg1: memref<2x1024xf32, #tpu.memory_space<vmem>>, %arg2: memref<1024x256xf32, #tpu.memory_space<vmem>>, %arg3: memref<1x256xf32, #tpu.memory_space<vmem>>, %arg4: memref<256x64xf32, #tpu.memory_space<vmem>>, %arg5: memref<1x64xf32, #tpu.memory_space<vmem>>, %arg6: memref<64x16xf32, #tpu.memory_space<vmem>>, %arg7: memref<1x16xf32, #tpu.memory_space<vmem>>, %arg8: memref<16x2xf32, #tpu.memory_space<vmem>>, %arg9: memref<1x2xf32, #tpu.memory_space<vmem>>, %arg10: memref<2x2xf32, #tpu.memory_space<vmem>>) attributes {dimension_semantics = [#tpu.dimension_semantics<parallel>], iteration_bounds = array<i64: 1>, scalar_prefetch = 0 : i64, scratch_operands = 0 : i64, tpu.core_type = #tpu.core_type<tc>, window_params = [{transform_indices = @transform_0, window_bounds = array<i64: 2, 1024>}, {pipeline_mode = #tpu.pipeline_mode<synchronous>, transform_indices = @transform_1, window_bounds = array<i64: 1024, 256>}, {pipeline_mode = #tpu.pipeline_mode<synchronous>, transform_indices = @transform_2, window_bounds = array<i64: 1, 256>}, {pipeline_mode = #tpu.pipeline_mode<synchronous>, transform_indices = @transform_3, window_bounds = array<i64: 256, 64>}, {pipeline_mode = #tpu.pipeline_mode<synchronous>, transform_indices = @transform_4, window_bounds = array<i64: 1, 64>}, {pipeline_mode = #tpu.pipeline_mode<synchronous>, transform_indices = @transform_5, window_bounds = array<i64: 64, 16>}, {pipeline_mode = #tpu.pipeline_mode<synchronous>, transform_indices = @transform_6, window_bounds = array<i64: 1, 16>}, {pipeline_mode = #tpu.pipeline_mode<synchronous>, transform_indices = @transform_7, window_bounds = array<i64: 16, 2>}, {pipeline_mode = #tpu.pipeline_mode<synchronous>, transform_indices = @transform_8, window_bounds = array<i64: 1, 2>}, {transform_indices = @transform_9, window_bounds = array<i64: 2, 2>}]} {
    %c0 = arith.constant 0 : index
    %c0_0 = arith.constant 0 : index
    %0 = vector.load %arg1[%c0, %c0_0] : memref<2x1024xf32, #tpu.memory_space<vmem>>, vector<2x1024xf32>
    %c0_1 = arith.constant 0 : index
    %c0_2 = arith.constant 0 : index
    %1 = vector.load %arg2[%c0_1, %c0_2] : memref<1024x256xf32, #tpu.memory_space<vmem>>, vector<1024x256xf32>
    %cst = arith.constant dense<0.000000e+00> : vector<2x256xf32>
    %2 = tpu.matmul %0, %1, %cst {dimension_numbers = #tpu.dot_dimension_numbers<[1], [0], [0], [1], [0, 0, 1, 1], [], []>} : vector<2x1024xf32>, vector<1024x256xf32>, vector<2x256xf32> -> vector<2x256xf32>
    %c0_3 = arith.constant 0 : index
    %c0_4 = arith.constant 0 : index
    %3 = vector.load %arg3[%c0_3, %c0_4] : memref<1x256xf32, #tpu.memory_space<vmem>>, vector<1x256xf32>
    %4 = vector.broadcast %3 : vector<1x256xf32> to vector<2x256xf32>
    %5 = arith.addf %2, %4 : vector<2x256xf32>
    %cst_5 = arith.constant 0.000000e+00 : f32
    %6 = vector.broadcast %cst_5 : f32 to vector<2x256xf32>
    %7 = arith.maximumf %5, %6 : vector<2x256xf32>
    %c0_6 = arith.constant 0 : index
    %c0_7 = arith.constant 0 : index
    %8 = vector.load %arg4[%c0_6, %c0_7] : memref<256x64xf32, #tpu.memory_space<vmem>>, vector<256x64xf32>
    %cst_8 = arith.constant dense<0.000000e+00> : vector<2x64xf32>
    %9 = tpu.matmul %7, %8, %cst_8 {dimension_numbers = #tpu.dot_dimension_numbers<[1], [0], [0], [1], [0, 0, 1, 1], [], []>} : vector<2x256xf32>, vector<256x64xf32>, vector<2x64xf32> -> vector<2x64xf32>
    %c0_9 = arith.constant 0 : index
    %c0_10 = arith.constant 0 : index
    %10 = vector.load %arg5[%c0_9, %c0_10] : memref<1x64xf32, #tpu.memory_space<vmem>>, vector<1x64xf32>
    %11 = vector.broadcast %10 : vector<1x64xf32> to vector<2x64xf32>
    %12 = arith.addf %9, %11 : vector<2x64xf32>
    %cst_11 = arith.constant 0.000000e+00 : f32
    %13 = vector.broadcast %cst_11 : f32 to vector<2x64xf32>
    %14 = arith.maximumf %12, %13 : vector<2x64xf32>
    %c0_12 = arith.constant 0 : index
    %c0_13 = arith.constant 0 : index
    %15 = vector.load %arg6[%c0_12, %c0_13] : memref<64x16xf32, #tpu.memory_space<vmem>>, vector<64x16xf32>
    %cst_14 = arith.constant dense<0.000000e+00> : vector<2x16xf32>
    %16 = tpu.matmul %14, %15, %cst_14 {dimension_numbers = #tpu.dot_dimension_numbers<[1], [0], [0], [1], [0, 0, 1, 1], [], []>} : vector<2x64xf32>, vector<64x16xf32>, vector<2x16xf32> -> vector<2x16xf32>
    %c0_15 = arith.constant 0 : index
    %c0_16 = arith.constant 0 : index
    %17 = vector.load %arg7[%c0_15, %c0_16] : memref<1x16xf32, #tpu.memory_space<vmem>>, vector<1x16xf32>
    %18 = vector.broadcast %17 : vector<1x16xf32> to vector<2x16xf32>
    %19 = arith.addf %16, %18 : vector<2x16xf32>
    %cst_17 = arith.constant 0.000000e+00 : f32
    %20 = vector.broadcast %cst_17 : f32 to vector<2x16xf32>
    %21 = arith.maximumf %19, %20 : vector<2x16xf32>
    %c0_18 = arith.constant 0 : index
    %c0_19 = arith.constant 0 : index
    %22 = vector.load %arg8[%c0_18, %c0_19] : memref<16x2xf32, #tpu.memory_space<vmem>>, vector<16x2xf32>
    %cst_20 = arith.constant dense<0.000000e+00> : vector<2x2xf32>
    %23 = tpu.matmul %21, %22, %cst_20 {dimension_numbers = #tpu.dot_dimension_numbers<[1], [0], [0], [1], [0, 0, 1, 1], [], []>} : vector<2x16xf32>, vector<16x2xf32>, vector<2x2xf32> -> vector<2x2xf32>
    %c0_21 = arith.constant 0 : index
    %c0_22 = arith.constant 0 : index
    %24 = vector.load %arg9[%c0_21, %c0_22] : memref<1x2xf32, #tpu.memory_space<vmem>>, vector<1x2xf32>
    %25 = vector.broadcast %24 : vector<1x2xf32> to vector<2x2xf32>
    %26 = arith.addf %23, %25 : vector<2x2xf32>
    %cst_23 = arith.constant dense<0xFF800000> : vector<2xf32>
    %27 = vector.multi_reduction <maximumf>, %26, %cst_23 [1] : vector<2x2xf32> to vector<2xf32>
    %28 = vector.shape_cast %27 : vector<2xf32> to vector<2x1xf32>
    %29 = vector.broadcast %28 : vector<2x1xf32> to vector<2x2xf32>
    %30 = arith.subf %26, %29 : vector<2x2xf32>
    %31 = math.exp %30 : vector<2x2xf32>
    %cst_24 = arith.constant dense<0.000000e+00> : vector<2xf32>
    %32 = vector.multi_reduction <add>, %31, %cst_24 [1] : vector<2x2xf32> to vector<2xf32>
    %33 = vector.shape_cast %32 : vector<2xf32> to vector<2x1xf32>
    %34 = vector.broadcast %33 : vector<2x1xf32> to vector<2x2xf32>
    %35 = arith.divf %31, %34 : vector<2x2xf32>
    %c0_25 = arith.constant 0 : index
    %c0_26 = arith.constant 0 : index
    %36 = vector.load %arg10[%c0_25, %c0_26] : memref<2x2xf32, #tpu.memory_space<vmem>>, vector<2x2xf32>
    tpu.vector_store %arg10[%c0_25, %c0_26], %35 {strides = array<i32>} : memref<2x2xf32, #tpu.memory_space<vmem>>, vector<2x2xf32>,
    return
  }
  func.func @transform_0(%arg0: i32) -> (i32, i32) {
    %c0_i32 = arith.constant 0 : i32
    %c0_i32_0 = arith.constant 0 : i32
    return %arg0, %c0_i32 : i32, i32
  }
  func.func @transform_1(%arg0: i32) -> (i32, i32) {
    %c0_i32 = arith.constant 0 : i32
    %c0_i32_0 = arith.constant 0 : i32
    %c0_i32_1 = arith.constant 0 : i32
    return %c0_i32, %c0_i32_0 : i32, i32
  }
  func.func @transform_2(%arg0: i32) -> (i32, i32) {
    %c0_i32 = arith.constant 0 : i32
    %c0_i32_0 = arith.constant 0 : i32
    %c0_i32_1 = arith.constant 0 : i32
    return %c0_i32, %c0_i32_0 : i32, i32
  }
  func.func @transform_3(%arg0: i32) -> (i32, i32) {
    %c0_i32 = arith.constant 0 : i32
    %c0_i32_0 = arith.constant 0 : i32
    %c0_i32_1 = arith.constant 0 : i32
    return %c0_i32, %c0_i32_0 : i32, i32
  }
  func.func @transform_4(%arg0: i32) -> (i32, i32) {
    %c0_i32 = arith.constant 0 : i32
    %c0_i32_0 = arith.constant 0 : i32
    %c0_i32_1 = arith.constant 0 : i32
    return %c0_i32, %c0_i32_0 : i32, i32
  }
  func.func @transform_5(%arg0: i32) -> (i32, i32) {
    %c0_i32 = arith.constant 0 : i32
    %c0_i32_0 = arith.constant 0 : i32
    %c0_i32_1 = arith.constant 0 : i32
    return %c0_i32, %c0_i32_0 : i32, i32
  }
  func.func @transform_6(%arg0: i32) -> (i32, i32) {
    %c0_i32 = arith.constant 0 : i32
    %c0_i32_0 = arith.constant 0 : i32
    %c0_i32_1 = arith.constant 0 : i32
    return %c0_i32, %c0_i32_0 : i32, i32
  }
  func.func @transform_7(%arg0: i32) -> (i32, i32) {
    %c0_i32 = arith.constant 0 : i32
    %c0_i32_0 = arith.constant 0 : i32
    %c0_i32_1 = arith.constant 0 : i32
    return %c0_i32, %c0_i32_0 : i32, i32
  }
  func.func @transform_8(%arg0: i32) -> (i32, i32) {
    %c0_i32 = arith.constant 0 : i32
    %c0_i32_0 = arith.constant 0 : i32
    %c0_i32_1 = arith.constant 0 : i32
    return %c0_i32, %c0_i32_0 : i32, i32
  }
  func.func @transform_9(%arg0: i32) -> (i32, i32) {
    %c0_i32 = arith.constant 0 : i32
    %c0_i32_0 = arith.constant 0 : i32
    return %arg0, %c0_i32 : i32, i32
  }
}

</mosaic_0001>

<bundles_post_ra>
// kernel: multiple_mlp_forward.1
= control target key start
LH: loop header
LB: loop body
LE: loop exit
PB: predicated region body
PF: predicated region fallthrough
CT: control target
= control target key end

     0   :  { %14 = vsyncpa [#allocation3], 0  ;;  %s1314_s0 = inlined_call_operand.vmem [shape: f32[2,1024], index: 0, kind: input, shape index: {}]   ;;  %s1315_s1 = inlined_call_operand.hbm [shape: f32[1024,256], index: 1, kind: input, shape index: {}]   ;;  %s1316_s2 = inlined_call_operand.vmem [shape: f32[1,256], index: 2, kind: input, shape index: {}]   ;;  %s1317_s3 = inlined_call_operand.vmem [shape: f32[256,64], index: 3, kind: input, shape index: {}]   ;;  %s1318_s4 = inlined_call_operand.vmem [shape: f32[1,64], index: 4, kind: input, shape index: {}]   ;;  %s1319_s5 = inlined_call_operand.vmem [shape: f32[64,16], index: 5, kind: input, shape index: {}]   ;;  %s1320_s6 = inlined_call_operand.vmem [shape: f32[1,16], index: 6, kind: input, shape index: {}]   ;;  %s1321_s7 = inlined_call_operand.vmem [shape: f32[16,2], index: 7, kind: input, shape index: {}]   ;;  %s1322_s8 = inlined_call_operand.vmem [shape: f32[1,2], index: 8, kind: input, shape index: {}]   ;;  %s1323_s9 = inlined_call_operand.hbm [shape: f32[2,2], index: 9, kind: output, shape index: {}]  }
   0x1   :  { %15 = vsyncpa [#allocation4], 0  ;;  %s1093_s30 = smov [#allocation2]  }
   0x2   :  { %s23_s10 = sshll.u32 %s1093_s30, 4  ;;  %s24_s10 = int_to_ptr.vmem [resolvable:$true] %s23_s10 }
   0x3   :  { %s1057_s11 = scalar_lea.vmem %s24_s10, 32768  ;;  %p1062_p1 = scmp.lt.s32.totalorder %s24_s10, %s24_s10 }
   0x4   :  { %p1058_p0 = scmp.ne.s32.totalorder %s24_s10, %s1057_s11  ;;  %p1063_p2 = scmp.lt.s32.totalorder %s1057_s11, %s1057_s11 }
   0x6   :  { %p1064_p3 = por %p1063_p2, %p1062_p1 }
   0x8   :  { %p1065_p4 = pnand %p1064_p3, %p1058_p0 }
   0xa   :  { %1068 = shalt.err (!%p1065_p4)
}
   0xb   :  { %s1094_s12 = smov 256   ;;  %s1095_s13 = smov 16  }
   0xc   :  { %29 = dma.hbm_to_vmem [thread:$0]  %s1315_s1, 32768, %s24_s10, [#allocation3], %s1094_s12, %s1094_s12, %s1095_s13  }
   0xd   :  { %1089 = dma.done.wait [#allocation3], 32768  }
   0xe   :  { %1090 = vsyncadd [#allocation3], 4294934528  ;;  %v80_v0 = vld [vmem:[#allocation2 + $0xf8] sm:$0xff]  ;;  %v79_v2 = vld [vmem:[#allocation2 + $0xf0] sm:$0xff]  ;;  %vm1098_vm0 = vmmov 0   ;;  %vm772_vm1 = vcmask 523264  }
   0xf   :  { %v144_v1 = vld [vmem:[#allocation2 + $0x2f8] sm:$0xff]  ;;  %361 = vmatprep.subr.mxu0 %v80_v0  ;;  %v143_v3 = vld [vmem:[#allocation2 + $0x2f0] sm:$0xff]  ;;  %v78_v4 = vld [vmem:[#allocation2 + $0xe8] sm:$0xff]  ;;  %vm856_vm2 = vcmask 130048   ;;  %vm930_vm3 = vcmask 9216  }
  0x10   :  { %432 = vmatprep.subr.mxu1 %v144_v1  ;;  %v142_v5 = vld [vmem:[#allocation2 + $0x2e8] sm:$0xff]  ;;  %362 = vmatpush1.msra.mxu0 %v79_v2  ;;  %v77_v6 = vld [vmem:[#allocation2 + $0xe0] sm:$0xff]  ;;  %v76_v8 = vld [vmem:[#allocation2 + $0xd8] sm:$0xff] }
  0x11   :  { %433 = vmatpush1.msra.mxu1 %v143_v3  ;;  %v141_v7 = vld [vmem:[#allocation2 + $0x2e0] sm:$0xff]  ;;  %363 = vmatprep.subr.mxu0 %v78_v4  ;;  %v140_v9 = vld [vmem:[#allocation2 + $0x2d8] sm:$0xff]  ;;  %v75_v10 = vld [vmem:[#allocation2 + $0xd0] sm:$0xff] }
  0x12   :  { %434 = vmatprep.subr.mxu1 %v142_v5  ;;  %v139_v11 = vld [vmem:[#allocation2 + $0x2d0] sm:$0xff]  ;;  %364 = vmatpush1.msra.mxu0 %v77_v6  ;;  %v74_v12 = vld [vmem:[#allocation2 + $0xc8] sm:$0xff]  ;;  %v73_v14 = vld [vmem:[#allocation2 + $0xc0] sm:$0xff] }
  0x13   :  { %435 = vmatpush1.msra.mxu1 %v141_v7  ;;  %v138_v13 = vld [vmem:[#allocation2 + $0x2c8] sm:$0xff]  ;;  %365 = vmatprep.subr.mxu0 %v76_v8  ;;  %v137_v15 = vld [vmem:[#allocation2 + $0x2c0] sm:$0xff]  ;;  %v72_v16 = vld [vmem:[#allocation2 + $0xb8] sm:$0xff] }
  0x14   :  { %436 = vmatprep.subr.mxu1 %v140_v9  ;;  %366 = vmatpush1.msra.mxu0 %v75_v10  ;;  %v136_v17 = vld [vmem:[#allocation2 + $0x2b8] sm:$0xff]  ;;  %v71_v18 = vld [vmem:[#allocation2 + $0xb0] sm:$0xff]  ;;  %v70_v20 = vld [vmem:[#allocation2 + $0xa8] sm:$0xff] }
  0x15   :  { %437 = vmatpush1.msra.mxu1 %v139_v11  ;;  %367 = vmatprep.subr.mxu0 %v74_v12  ;;  %v135_v19 = vld [vmem:[#allocation2 + $0x2b0] sm:$0xff]  ;;  %v134_v21 = vld [vmem:[#allocation2 + $0x2a8] sm:$0xff]  ;;  %v69_v22 = vld [vmem:[#allocation2 + $0xa0] sm:$0xff] }
  0x16   :  { %438 = vmatprep.subr.mxu1 %v138_v13  ;;  %368 = vmatpush1.msra.mxu0 %v73_v14  ;;  %v133_v23 = vld [vmem:[#allocation2 + $0x2a0] sm:$0xff]  ;;  %v68_v24 = vld [vmem:[#allocation2 + $0x98] sm:$0xff]  ;;  %v67_v26 = vld [vmem:[#allocation2 + $0x90] sm:$0xff] }
  0x17   :  { %439 = vmatpush1.msra.mxu1 %v137_v15  ;;  %369 = vmatprep.subr.mxu0 %v72_v16  ;;  %v132_v25 = vld [vmem:[#allocation2 + $0x298] sm:$0xff]  ;;  %v131_v27 = vld [vmem:[#allocation2 + $0x290] sm:$0xff]  ;;  %v66_v28 = vld [vmem:[#allocation2 + $0x88] sm:$0xff] }
  0x18   :  { %440 = vmatprep.subr.mxu1 %v136_v17  ;;  %370 = vmatpush1.msra.mxu0 %v71_v18  ;;  %v130_v29 = vld [vmem:[#allocation2 + $0x288] sm:$0xff]  ;;  %v65_v30 = vld [vmem:[#allocation2 + $0x80] sm:$0xff]  ;;  %v64_v32 = vld [vmem:[#allocation2 + $0x78] sm:$0xff] }
  0x19   :  { %441 = vmatpush1.msra.mxu1 %v135_v19  ;;  %371 = vmatprep.subr.mxu0 %v70_v20  ;;  %v129_v31 = vld [vmem:[#allocation2 + $0x280] sm:$0xff]  ;;  %v128_v33 = vld [vmem:[#allocation2 + $0x278] sm:$0xff]  ;;  %v63_v34 = vld [vmem:[#allocation2 + $0x70] sm:$0xff] }
  0x1a   :  { %442 = vmatprep.subr.mxu1 %v134_v21  ;;  %372 = vmatpush1.msra.mxu0 %v69_v22  ;;  %v127_v35 = vld [vmem:[#allocation2 + $0x270] sm:$0xff]  ;;  %v62_v36 = vld [vmem:[#allocation2 + $0x68] sm:$0xff]  ;;  %v61_v38 = vld [vmem:[#allocation2 + $0x60] sm:$0xff] }
  0x1b   :  { %443 = vmatpush1.msra.mxu1 %v133_v23  ;;  %373 = vmatprep.subr.mxu0 %v68_v24  ;;  %v126_v37 = vld [vmem:[#allocation2 + $0x268] sm:$0xff]  ;;  %v125_v39 = vld [vmem:[#allocation2 + $0x260] sm:$0xff]  ;;  %v60_v40 = vld [vmem:[#allocation2 + $0x58] sm:$0xff] }
  0x1c   :  { %444 = vmatprep.subr.mxu1 %v132_v25  ;;  %374 = vmatpush1.msra.mxu0 %v67_v26  ;;  %v124_v41 = vld [vmem:[#allocation2 + $0x258] sm:$0xff]  ;;  %v59_v42 = vld [vmem:[#allocation2 + $0x50] sm:$0xff]  ;;  %v58_v44 = vld [vmem:[#allocation2 + $0x48] sm:$0xff] }
  0x1d   :  { %445 = vmatpush1.msra.mxu1 %v131_v27  ;;  %375 = vmatprep.subr.mxu0 %v66_v28  ;;  %v123_v43 = vld [vmem:[#allocation2 + $0x250] sm:$0xff]  ;;  %v122_v45 = vld [vmem:[#allocation2 + $0x248] sm:$0xff]  ;;  %v57_v46 = vld [vmem:[#allocation2 + $0x40] sm:$0xff] }
  0x1e   :  { %446 = vmatprep.subr.mxu1 %v130_v29  ;;  %376 = vmatpush1.msra.mxu0 %v65_v30  ;;  %v121_v47 = vld [vmem:[#allocation2 + $0x240] sm:$0xff]  ;;  %v56_v48 = vld [vmem:[#allocation2 + $0x38] sm:$0xff]  ;;  %v55_v50 = vld [vmem:[#allocation2 + $0x30] sm:$0xff]  ;;  %v307_v30 = vlaneseq }
  0x1f   :  { %447 = vmatpush1.msra.mxu1 %v129_v31  ;;  %377 = vmatprep.subr.mxu0 %v64_v32  ;;  %v120_v49 = vld [vmem:[#allocation2 + $0x238] sm:$0xff]  ;;  %v119_v51 = vld [vmem:[#allocation2 + $0x230] sm:$0xff]  ;;  %v54_v52 = vld [vmem:[#allocation2 + $0x28] sm:$0xff]  ;;  %v1096_v31 = vmov 1983009808  }
  0x20   :  { %448 = vmatprep.subr.mxu1 %v128_v33  ;;  %378 = vmatpush1.msra.mxu0 %v63_v34  ;;  %v118_v53 = vld [vmem:[#allocation2 + $0x228] sm:$0xff]  ;;  %v53_v54 = vld [vmem:[#allocation2 + $0x20] sm:$0xff]  ;;  %v52_v56 = vld [vmem:[#allocation2 + $0x18] sm:$0xff]  ;;  %v321_v32 = vunpack.c.l.s4 %v1096_v31 }
  0x21   :  { %449 = vmatpush1.msra.mxu1 %v127_v35  ;;  %379 = vmatprep.subr.mxu0 %v62_v36  ;;  %v117_v55 = vld [vmem:[#allocation2 + $0x220] sm:$0xff]  ;;  %v116_v57 = vld [vmem:[#allocation2 + $0x218] sm:$0xff]  ;;  %v51_v58 = vld [vmem:[#allocation2 + $0x10] sm:$0xff] }
  0x22   :  { %450 = vmatprep.subr.mxu1 %v126_v37  ;;  %380 = vmatpush1.msra.mxu0 %v61_v38  ;;  %v115_v59 = vld [vmem:[#allocation2 + $0x210] sm:$0xff]  ;;  %v50_v60 = vld [vmem:[#allocation2 + $0x8] sm:$0xff]  ;;  %v49_v62 = vld [vmem:[#allocation2] sm:$0xff] }
  0x23   :  { %451 = vmatpush1.msra.mxu1 %v125_v39  ;;  %381 = vmatprep.subr.mxu0 %v60_v40  ;;  %v114_v61 = vld [vmem:[#allocation2 + $0x208] sm:$0xff]  ;;  %v113_v63 = vld [vmem:[#allocation2 + $0x200] sm:$0xff]  ;;  %v112_v0 = vld [vmem:[#allocation2 + $0x1f8] sm:$0xff] }
  0x24   :  { %452 = vmatprep.subr.mxu1 %v124_v41  ;;  %382 = vmatpush1.msra.mxu0 %v59_v42  ;;  %v176_v1 = vld [vmem:[#allocation2 + $0x3f8] sm:$0xff]  ;;  %v111_v2 = vld [vmem:[#allocation2 + $0x1f0] sm:$0xff]  ;;  %v110_v4 = vld [vmem:[#allocation2 + $0x1e8] sm:$0xff]  ;;  %v1153_v41 = vshrl.u32 %v307_v30, 7  ;;  %v322_v42 = vunpack.c.0.s8 %v321_v32 }
  0x25   :  { %453 = vmatpush1.msra.mxu1 %v123_v43  ;;  %383 = vmatprep.subr.mxu0 %v58_v44  ;;  %v175_v3 = vld [vmem:[#allocation2 + $0x3f0] sm:$0xff]  ;;  %v174_v5 = vld [vmem:[#allocation2 + $0x3e8] sm:$0xff]  ;;  %v109_v6 = vld [vmem:[#allocation2 + $0x1e0] sm:$0xff] }
  0x26   :  { %454 = vmatprep.subr.mxu1 %v122_v45  ;;  %384 = vmatpush1.msra.mxu0 %v57_v46  ;;  %v173_v7 = vld [vmem:[#allocation2 + $0x3e0] sm:$0xff]  ;;  %v108_v8 = vld [vmem:[#allocation2 + $0x1d8] sm:$0xff]  ;;  %v107_v10 = vld [vmem:[#allocation2 + $0x1d0] sm:$0xff] }
  0x27   :  { %455 = vmatpush1.msra.mxu1 %v121_v47  ;;  %385 = vmatprep.subr.mxu0 %v56_v48  ;;  %v172_v9 = vld [vmem:[#allocation2 + $0x3d8] sm:$0xff]  ;;  %v171_v11 = vld [vmem:[#allocation2 + $0x3d0] sm:$0xff]  ;;  %v106_v12 = vld [vmem:[#allocation2 + $0x1c8] sm:$0xff] }
  0x28   :  { %456 = vmatprep.subr.mxu1 %v120_v49  ;;  %386 = vmatpush1.msra.mxu0 %v55_v50  ;;  %v170_v13 = vld [vmem:[#allocation2 + $0x3c8] sm:$0xff]  ;;  %v105_v14 = vld [vmem:[#allocation2 + $0x1c0] sm:$0xff]  ;;  %v104_v16 = vld [vmem:[#allocation2 + $0x1b8] sm:$0xff] }
  0x29   :  { %457 = vmatpush1.msra.mxu1 %v119_v51  ;;  %387 = vmatprep.subr.mxu0 %v54_v52  ;;  %v169_v15 = vld [vmem:[#allocation2 + $0x3c0] sm:$0xff]  ;;  %v168_v17 = vld [vmem:[#allocation2 + $0x3b8] sm:$0xff]  ;;  %v103_v18 = vld [vmem:[#allocation2 + $0x1b0] sm:$0xff]  ;;  %v1159_v52 = vsub.s32 %v322_v42, %v1153_v41 }
  0x2a   :  { %458 = vmatprep.subr.mxu1 %v118_v53  ;;  %388 = vmatpush1.msra.mxu0 %v53_v54  ;;  %v167_v19 = vld [vmem:[#allocation2 + $0x3b0] sm:$0xff]  ;;  %v102_v20 = vld [vmem:[#allocation2 + $0x1a8] sm:$0xff]  ;;  %v101_v22 = vld [vmem:[#allocation2 + $0x1a0] sm:$0xff] }
  0x2b   :  { %459 = vmatpush1.msra.mxu1 %v117_v55  ;;  %389 = vmatprep.subr.mxu0 %v52_v56  ;;  %v166_v21 = vld [vmem:[#allocation2 + $0x3a8] sm:$0xff]  ;;  %v165_v23 = vld [vmem:[#allocation2 + $0x3a0] sm:$0xff]  ;;  %v100_v24 = vld [vmem:[#allocation2 + $0x198] sm:$0xff] }
  0x2c   :  { %460 = vmatprep.subr.mxu1 %v116_v57  ;;  %390 = vmatpush1.msra.mxu0 %v51_v58  ;;  %v164_v25 = vld [vmem:[#allocation2 + $0x398] sm:$0xff]  ;;  %v99_v26 = vld [vmem:[#allocation2 + $0x190] sm:$0xff]  ;;  %v98_v28 = vld [vmem:[#allocation2 + $0x188] sm:$0xff] }
  0x2d   :  { %461 = vmatpush1.msra.mxu1 %v115_v59  ;;  %391 = vmatprep.subr.mxu0 %v50_v60  ;;  %v163_v27 = vld [vmem:[#allocation2 + $0x390] sm:$0xff]  ;;  %v162_v29 = vld [vmem:[#allocation2 + $0x388] sm:$0xff]  ;;  %v97_v33 = vld [vmem:[#allocation2 + $0x180] sm:$0xff] }
  0x2e   :  { %462 = vmatprep.subr.mxu1 %v114_v61  ;;  %392 = vmatpush1.msra.mxu0 %v49_v62  ;;  %v161_v34 = vld [vmem:[#allocation2 + $0x380] sm:$0xff]  ;;  %v96_v35 = vld [vmem:[#allocation2 + $0x178] sm:$0xff]  ;;  %v95_v37 = vld [vmem:[#allocation2 + $0x170] sm:$0xff] }
  0x2f   :  { %463 = vmatpush1.msra.mxu1 %v113_v63  ;;  %393 = vmatprep.subr.mxu0 %v112_v0  ;;  %v160_v36 = vld [vmem:[#allocation2 + $0x378] sm:$0xff]  ;;  %v159_v38 = vld [vmem:[#allocation2 + $0x370] sm:$0xff]  ;;  %v94_v39 = vld [vmem:[#allocation2 + $0x168] sm:$0xff] }
  0x30   :  { %464 = vmatprep.subr.mxu1 %v176_v1  ;;  %394 = vmatpush2.msra.mxu0 %v111_v2  ;;  %v158_v40 = vld [vmem:[#allocation2 + $0x368] sm:$0xff]  ;;  %v93_v43 = vld [vmem:[#allocation2 + $0x160] sm:$0xff]  ;;  %v92_v45 = vld [vmem:[#allocation2 + $0x158] sm:$0xff] }
  0x31   :  { %465 = vmatpush2.msra.mxu1 %v175_v3  ;;  %395 = vmatprep.subr.mxu0 %v110_v4  ;;  %v157_v44 = vld [vmem:[#allocation2 + $0x360] sm:$0xff]  ;;  %v156_v46 = vld [vmem:[#allocation2 + $0x358] sm:$0xff]  ;;  %v91_v47 = vld [vmem:[#allocation2 + $0x150] sm:$0xff] }
  0x32   :  { %466 = vmatprep.subr.mxu1 %v174_v5  ;;  %396 = vmatpush2.msra.mxu0 %v109_v6  ;;  %v155_v48 = vld [vmem:[#allocation2 + $0x350] sm:$0xff]  ;;  %v47_v49 = vld [vmem:[%s1314_s0] sm:$0xff]  ;;  %v90_v50 = vld [vmem:[#allocation2 + $0x148] sm:$0xff] }
  0x33   :  { %467 = vmatpush2.msra.mxu1 %v173_v7  ;;  %397 = vmatprep.subr.mxu0 %v108_v8  ;;  %v154_v51 = vld [vmem:[#allocation2 + $0x348] sm:$0xff]  ;;  %v89_v53 = vld [vmem:[#allocation2 + $0x140] sm:$0xff]  ;;  %v88_v55 = vld [vmem:[#allocation2 + $0x138] sm:$0xff]  ;;  %v319_v57 = vcombine.high %v47_v49, %v47_v49  ;;  %v326_v62 = vrot.slane %v47_v49, %v1159_v52 }
  0x34   :  { %468 = vmatprep.subr.mxu1 %v172_v9  ;;  %398 = vmatpush2.msra.mxu0 %v107_v10  ;;  %v153_v54 = vld [vmem:[#allocation2 + $0x340] sm:$0xff]  ;;  %v152_v56 = vld [vmem:[#allocation2 + $0x338] sm:$0xff]  ;;  %v87_v58 = vld [vmem:[#allocation2 + $0x130] sm:$0xff] }
  0x35   :  { %469 = vmatpush2.msra.mxu1 %v171_v11  ;;  %399 = vmatprep.subr.mxu0 %v106_v12  ;;  %v151_v59 = vld [vmem:[#allocation2 + $0x330] sm:$0xff]  ;;  %v86_v60 = vld [vmem:[#allocation2 + $0x128] sm:$0xff]  ;;  %v85_v63 = vld [vmem:[#allocation2 + $0x120] sm:$0xff]  ;;  %v333_v3 = vrot.slane %v319_v57, %v1159_v52  ;;  %v334_v8 = vcombine.high %v326_v62, %v326_v62 }
  0x36   :  { %470 = vmatprep.subr.mxu1 %v170_v13  ;;  %400 = vmatpush2.msra.mxu0 %v105_v14  ;;  %v150_v61 = vld [vmem:[#allocation2 + $0x328] sm:$0xff]  ;;  %v149_v0 = vld [vmem:[#allocation2 + $0x320] sm:$0xff]  ;;  %v84_v1 = vld [vmem:[#allocation2 + $0x118] sm:$0xff] }
  0x37   :  { %471 = vmatpush2.msra.mxu1 %v169_v15  ;;  %401 = vmatprep.subr.mxu0 %v104_v16  ;;  %v148_v2 = vld [vmem:[#allocation2 + $0x318] sm:$0xff]  ;;  %v83_v4 = vld [vmem:[#allocation2 + $0x110] sm:$0xff]  ;;  %v82_v6 = vld [vmem:[#allocation2 + $0x108] sm:$0xff]  ;;  %v335_v11 = vcombine.high %v333_v3, %v333_v3 }
  0x38   :  { %472 = vmatprep.subr.mxu1 %v168_v17  ;;  %402 = vmatpush2.msra.mxu0 %v103_v18  ;;  %v147_v5 = vld [vmem:[#allocation2 + $0x310] sm:$0xff]  ;;  %v146_v7 = vld [vmem:[#allocation2 + $0x308] sm:$0xff]  ;;  %v81_v9 = vld [vmem:[#allocation2 + $0x100] sm:$0xff] }
  0x39   :  { %473 = vmatpush2.msra.mxu1 %v167_v19  ;;  %403 = vmatprep.subr.mxu0 %v102_v20  ;;  %v145_v10 = vld [vmem:[#allocation2 + $0x300] sm:$0xff]  ;;  %v208_v12 = vld [vmem:[#allocation2 + $0x4f8] sm:$0xff]  ;;  %v207_v14 = vld [vmem:[#allocation2 + $0x4f0] sm:$0xff] }
  0x3a   :  { %474 = vmatprep.subr.mxu1 %v166_v21  ;;  %404 = vmatpush2.msra.mxu0 %v101_v22  ;;  %v272_v13 = vld [vmem:[#allocation2 + $0x6f8] sm:$0xff]  ;;  %v271_v15 = vld [vmem:[#allocation2 + $0x6f0] sm:$0xff]  ;;  %v206_v16 = vld [vmem:[#allocation2 + $0x4e8] sm:$0xff] }
  0x3b   :  { %475 = vmatpush2.msra.mxu1 %v165_v23  ;;  %405 = vmatprep.subr.mxu0 %v100_v24  ;;  %v270_v17 = vld [vmem:[#allocation2 + $0x6e8] sm:$0xff]  ;;  %v205_v18 = vld [vmem:[#allocation2 + $0x4e0] sm:$0xff]  ;;  %v204_v20 = vld [vmem:[#allocation2 + $0x4d8] sm:$0xff] }
  0x3c   :  { %476 = vmatprep.subr.mxu1 %v164_v25  ;;  %406 = vmatpush2.msra.mxu0 %v99_v26  ;;  %v269_v19 = vld [vmem:[#allocation2 + $0x6e0] sm:$0xff]  ;;  %v268_v21 = vld [vmem:[#allocation2 + $0x6d8] sm:$0xff]  ;;  %v203_v22 = vld [vmem:[#allocation2 + $0x4d0] sm:$0xff] }
  0x3d   :  { %477 = vmatpush2.msra.mxu1 %v163_v27  ;;  %407 = vmatprep.subr.mxu0 %v98_v28  ;;  %v267_v23 = vld [vmem:[#allocation2 + $0x6d0] sm:$0xff]  ;;  %v202_v24 = vld [vmem:[#allocation2 + $0x4c8] sm:$0xff]  ;;  %v201_v26 = vld [vmem:[#allocation2 + $0x4c0] sm:$0xff] }
  0x3e   :  { %478 = vmatprep.subr.mxu1 %v162_v29  ;;  %408 = vmatpush2.msra.mxu0 %v97_v33  ;;  %v266_v25 = vld [vmem:[#allocation2 + $0x6c8] sm:$0xff]  ;;  %v265_v27 = vld [vmem:[#allocation2 + $0x6c0] sm:$0xff]  ;;  %v200_v28 = vld [vmem:[#allocation2 + $0x4b8] sm:$0xff] }
  0x3f   :  { %479 = vmatpush2.msra.mxu1 %v161_v34  ;;  %409 = vmatprep.subr.mxu0 %v96_v35  ;;  %v264_v29 = vld [vmem:[#allocation2 + $0x6b8] sm:$0xff]  ;;  %v199_v30 = vld [vmem:[#allocation2 + $0x4b0] sm:$0xff]  ;;  %v198_v32 = vld [vmem:[#allocation2 + $0x4a8] sm:$0xff] }
  0x40   :  { %480 = vmatprep.subr.mxu1 %v160_v36  ;;  %410 = vmatpush2.msra.mxu0 %v95_v37  ;;  %v263_v31 = vld [vmem:[#allocation2 + $0x6b0] sm:$0xff]  ;;  %v262_v33 = vld [vmem:[#allocation2 + $0x6a8] sm:$0xff]  ;;  %v197_v34 = vld [vmem:[#allocation2 + $0x4a0] sm:$0xff] }
  0x41   :  { %481 = vmatpush2.msra.mxu1 %v159_v38  ;;  %411 = vmatprep.subr.mxu0 %v94_v39  ;;  %v261_v35 = vld [vmem:[#allocation2 + $0x6a0] sm:$0xff]  ;;  %v196_v36 = vld [vmem:[#allocation2 + $0x498] sm:$0xff]  ;;  %v195_v38 = vld [vmem:[#allocation2 + $0x490] sm:$0xff] }
  0x42   :  { %482 = vmatprep.subr.mxu1 %v158_v40  ;;  %412 = vmatpush2.msra.mxu0 %v93_v43  ;;  %v260_v37 = vld [vmem:[#allocation2 + $0x698] sm:$0xff]  ;;  %v259_v39 = vld [vmem:[#allocation2 + $0x690] sm:$0xff]  ;;  %v194_v40 = vld [vmem:[#allocation2 + $0x488] sm:$0xff] }
  0x43   :  { %483 = vmatpush2.msra.mxu1 %v157_v44  ;;  %413 = vmatprep.subr.mxu0 %v92_v45  ;;  %v258_v42 = vld [vmem:[#allocation2 + $0x688] sm:$0xff]  ;;  %v193_v43 = vld [vmem:[#allocation2 + $0x480] sm:$0xff]  ;;  %v192_v45 = vld [vmem:[#allocation2 + $0x478] sm:$0xff] }
  0x44   :  { %484 = vmatprep.subr.mxu1 %v156_v46  ;;  %414 = vmatpush2.msra.mxu0 %v91_v47  ;;  %v257_v44 = vld [vmem:[#allocation2 + $0x680] sm:$0xff]  ;;  %v256_v46 = vld [vmem:[#allocation2 + $0x678] sm:$0xff]  ;;  %v191_v47 = vld [vmem:[#allocation2 + $0x470] sm:$0xff] }
  0x45   :  { %485 = vmatpush2.msra.mxu1 %v155_v48  ;;  %415 = vmatprep.subr.mxu0 %v90_v50  ;;  %v255_v48 = vld [vmem:[#allocation2 + $0x670] sm:$0xff]  ;;  %v190_v49 = vld [vmem:[#allocation2 + $0x468] sm:$0xff] }
  0x46   :  { %486 = vmatprep.subr.mxu1 %v154_v51  ;;  %416 = vmatpush2.msra.mxu0 %v89_v53  ;;  %v254_v50 = vld [vmem:[#allocation2 + $0x668] sm:$0xff]  ;;  %v189_v51 = vld [vmem:[#allocation2 + $0x460] sm:$0xff]  ;;  %v251_v57 = vld [vmem:[#allocation2 + $0x650] sm:$0xff] }
  0x47   :  { %487 = vmatpush2.msra.mxu1 %v153_v54  ;;  %417 = vmatprep.subr.mxu0 %v88_v55  ;;  %v253_v53 = vld [vmem:[#allocation2 + $0x660] sm:$0xff]  ;;  %v188_v54 = vld [vmem:[#allocation2 + $0x458] sm:$0xff] }
  0x48   :  { %488 = vmatprep.subr.mxu1 %v152_v56  ;;  %418 = vmatpush2.msra.mxu0 %v87_v58  ;;  %v252_v55 = vld [vmem:[#allocation2 + $0x658] sm:$0xff]  ;;  %v187_v56 = vld [vmem:[#allocation2 + $0x450] sm:$0xff]  ;;  %v186_v58 = vld [vmem:[#allocation2 + $0x448] sm:$0xff] }
  0x49   :  { %489 = vmatpush2.msra.mxu1 %v151_v59  ;;  %419 = vmatprep.subr.mxu0 %v86_v60  ;;  %v250_v59 = vld [vmem:[#allocation2 + $0x648] sm:$0xff]  ;;  %v185_v60 = vld [vmem:[#allocation2 + $0x440] sm:$0xff] }
  0x4a   :  { %490 = vmatprep.subr.mxu1 %v150_v61  ;;  %420 = vmatpush2.msra.mxu0 %v85_v63  ;;  %v249_v61 = vld [vmem:[#allocation2 + $0x640] sm:$0xff]  ;;  %v248_v63 = vld [vmem:[#allocation2 + $0x638] sm:$0xff] }
  0x4b   :  { %491 = vmatpush2.msra.mxu1 %v149_v0  ;;  %421 = vmatprep.subr.mxu0 %v84_v1  ;;  %v183_v0 = vld [vmem:[#allocation2 + $0x430] sm:$0xff] }
  0x4c   :  { %492 = vmatprep.subr.mxu1 %v148_v2  ;;  %422 = vmatpush2.msra.mxu0 %v83_v4  ;;  %v247_v1 = vld [vmem:[#allocation2 + $0x630] sm:$0xff]  ;;  %v182_v2 = vld [vmem:[#allocation2 + $0x428] sm:$0xff]  ;;  %v181_v4 = vld [vmem:[#allocation2 + $0x420] sm:$0xff] }
  0x4d   :  { %493 = vmatpush2.msra.mxu1 %v147_v5  ;;  %423 = vmatprep.subr.mxu0 %v82_v6  ;;  %v245_v5 = vld [vmem:[#allocation2 + $0x620] sm:$0xff]  ;;  %v180_v6 = vld [vmem:[#allocation2 + $0x418] sm:$0xff] }
  0x4e   :  { %494 = vmatprep.subr.mxu1 %v146_v7  ;;  %424 = vmatpush2.msra.mxu0 %v81_v9  ;;  %v244_v7 = vld [vmem:[#allocation2 + $0x618] sm:$0xff]  ;;  %v243_v9 = vld [vmem:[#allocation2 + $0x610] sm:$0xff] }
  0x4f   :  { %425 = vmatprep.mubr.f32.mxu0 %v334_v8  ;;  %495 = vmatpush2.msra.mxu1 %v145_v10  ;;  %v179_v8 = vld [vmem:[#allocation2 + $0x410] sm:$0xff]  ;;  %v178_v10 = vld [vmem:[#allocation2 + $0x408] sm:$0xff] }
  0x50   :  { %426 = vmatmul.mubr.f32.vlgmr.msra.gmra.mxu0 %v326_v62  ;;  %496 = vmatprep.mubr.f32.mxu1 %v335_v11  ;;  %v184_v62 = vld [vmem:[#allocation2 + $0x438] sm:$0xff]  ;;  %v242_v11 = vld [vmem:[#allocation2 + $0x608] sm:$0xff] }
  0x51   :  { %503 = vmatprep.subr.mxu0 %v208_v12  ;;  %574 = vmatprep.subr.mxu1 %v272_v13  ;;  %v177_v12 = vld [vmem:[#allocation2 + $0x400] sm:$0xff] }
  0x52   :  { %497 = vmatmul.mubr.f32.vlgmr.msra.gmra.mxu1 %v333_v3  ;;  %504 = vmatpush1.msra.mxu0 %v207_v14  ;;  %v246_v3 = vld [vmem:[#allocation2 + $0x628] sm:$0xff]  ;;  %v241_v13 = vld [vmem:[#allocation2 + $0x600] sm:$0xff]  ;;  %v240_v14 = vld [vmem:[#allocation2 + $0x5f8] sm:$0xff] }
  0x53   :  { %575 = vmatpush1.msra.mxu1 %v271_v15  ;;  %505 = vmatprep.subr.mxu0 %v206_v16  ;;  %v304_v15 = vld [vmem:[#allocation2 + $0x7f8] sm:$0xff]  ;;  %v239_v16 = vld [vmem:[#allocation2 + $0x5f0] sm:$0xff] }
  0x54   :  { %576 = vmatprep.subr.mxu1 %v270_v17  ;;  %506 = vmatpush1.msra.mxu0 %v205_v18  ;;  %v303_v17 = vld [vmem:[#allocation2 + $0x7f0] sm:$0xff]  ;;  %v238_v18 = vld [vmem:[#allocation2 + $0x5e8] sm:$0xff] }
  0x55   :  { %577 = vmatpush1.msra.mxu1 %v269_v19  ;;  %507 = vmatprep.subr.mxu0 %v204_v20  ;;  %v302_v19 = vld [vmem:[#allocation2 + $0x7e8] sm:$0xff]  ;;  %v237_v20 = vld [vmem:[#allocation2 + $0x5e0] sm:$0xff] }
  0x56   :  { %578 = vmatprep.subr.mxu1 %v268_v21  ;;  %508 = vmatpush1.msra.mxu0 %v203_v22  ;;  %v301_v21 = vld [vmem:[#allocation2 + $0x7e0] sm:$0xff]  ;;  %v236_v22 = vld [vmem:[#allocation2 + $0x5d8] sm:$0xff] }
  0x57   :  { %579 = vmatpush1.msra.mxu1 %v267_v23  ;;  %509 = vmatprep.subr.mxu0 %v202_v24  ;;  %v300_v23 = vld [vmem:[#allocation2 + $0x7d8] sm:$0xff]  ;;  %v235_v24 = vld [vmem:[#allocation2 + $0x5d0] sm:$0xff] }
  0x58   :  { %580 = vmatprep.subr.mxu1 %v266_v25  ;;  %510 = vmatpush1.msra.mxu0 %v201_v26  ;;  %v299_v25 = vld [vmem:[#allocation2 + $0x7d0] sm:$0xff]  ;;  %v234_v26 = vld [vmem:[#allocation2 + $0x5c8] sm:$0xff] }
  0x59   :  { %581 = vmatpush1.msra.mxu1 %v265_v27  ;;  %511 = vmatprep.subr.mxu0 %v200_v28  ;;  %v298_v27 = vld [vmem:[#allocation2 + $0x7c8] sm:$0xff]  ;;  %v233_v28 = vld [vmem:[#allocation2 + $0x5c0] sm:$0xff] }
  0x5a   :  { %582 = vmatprep.subr.mxu1 %v264_v29  ;;  %512 = vmatpush1.msra.mxu0 %v199_v30  ;;  %v297_v29 = vld [vmem:[#allocation2 + $0x7c0] sm:$0xff]  ;;  %v232_v30 = vld [vmem:[#allocation2 + $0x5b8] sm:$0xff] }
  0x5b   :  { %583 = vmatpush1.msra.mxu1 %v263_v31  ;;  %513 = vmatprep.subr.mxu0 %v198_v32  ;;  %v296_v31 = vld [vmem:[#allocation2 + $0x7b8] sm:$0xff]  ;;  %v231_v32 = vld [vmem:[#allocation2 + $0x5b0] sm:$0xff] }
  0x5c   :  { %584 = vmatprep.subr.mxu1 %v262_v33  ;;  %514 = vmatpush1.msra.mxu0 %v197_v34  ;;  %v295_v33 = vld [vmem:[#allocation2 + $0x7b0] sm:$0xff]  ;;  %v230_v34 = vld [vmem:[#allocation2 + $0x5a8] sm:$0xff] }
  0x5d   :  { %585 = vmatpush1.msra.mxu1 %v261_v35  ;;  %515 = vmatprep.subr.mxu0 %v196_v36  ;;  %v294_v35 = vld [vmem:[#allocation2 + $0x7a8] sm:$0xff]  ;;  %v229_v36 = vld [vmem:[#allocation2 + $0x5a0] sm:$0xff] }
  0x5e   :  { %586 = vmatprep.subr.mxu1 %v260_v37  ;;  %516 = vmatpush1.msra.mxu0 %v195_v38  ;;  %v293_v37 = vld [vmem:[#allocation2 + $0x7a0] sm:$0xff]  ;;  %v228_v38 = vld [vmem:[#allocation2 + $0x598] sm:$0xff] }
  0x5f   :  { %587 = vmatpush1.msra.mxu1 %v259_v39  ;;  %517 = vmatprep.subr.mxu0 %v194_v40  ;;  %v292_v39 = vld [vmem:[#allocation2 + $0x798] sm:$0xff]  ;;  %v227_v40 = vld [vmem:[#allocation2 + $0x590] sm:$0xff] }
  0x60   :  { %588 = vmatprep.subr.mxu1 %v258_v42  ;;  %518 = vmatpush1.msra.mxu0 %v193_v43  ;;  %v291_v42 = vld [vmem:[#allocation2 + $0x790] sm:$0xff]  ;;  %v226_v43 = vld [vmem:[#allocation2 + $0x588] sm:$0xff] }
  0x61   :  { %589 = vmatpush1.msra.mxu1 %v257_v44  ;;  %519 = vmatprep.subr.mxu0 %v192_v45  ;;  %v290_v44 = vld [vmem:[#allocation2 + $0x788] sm:$0xff]  ;;  %v225_v45 = vld [vmem:[#allocation2 + $0x580] sm:$0xff] }
  0x62   :  { %590 = vmatprep.subr.mxu1 %v256_v46  ;;  %520 = vmatpush1.msra.mxu0 %v191_v47  ;;  %v289_v46 = vld [vmem:[#allocation2 + $0x780] sm:$0xff]  ;;  %v224_v47 = vld [vmem:[#allocation2 + $0x578] sm:$0xff] }
  0x63   :  { %591 = vmatpush1.msra.mxu1 %v255_v48  ;;  %521 = vmatprep.subr.mxu0 %v190_v49  ;;  %v288_v48 = vld [vmem:[#allocation2 + $0x778] sm:$0xff]  ;;  %v223_v49 = vld [vmem:[#allocation2 + $0x570] sm:$0xff] }
  0x64   :  { %592 = vmatprep.subr.mxu1 %v254_v50  ;;  %522 = vmatpush1.msra.mxu0 %v189_v51  ;;  %v287_v50 = vld [vmem:[#allocation2 + $0x770] sm:$0xff]  ;;  %v222_v51 = vld [vmem:[#allocation2 + $0x568] sm:$0xff] }
  0x65   :  { %593 = vmatpush1.msra.mxu1 %v253_v53  ;;  %523 = vmatprep.subr.mxu0 %v188_v54  ;;  %v286_v53 = vld [vmem:[#allocation2 + $0x768] sm:$0xff]  ;;  %v221_v54 = vld [vmem:[#allocation2 + $0x560] sm:$0xff] }
  0x66   :  { %594 = vmatprep.subr.mxu1 %v252_v55  ;;  %524 = vmatpush1.msra.mxu0 %v187_v56  ;;  %v285_v55 = vld [vmem:[#allocation2 + $0x760] sm:$0xff]  ;;  %v220_v56 = vld [vmem:[#allocation2 + $0x558] sm:$0xff] }
  0x67   :  { %595 = vmatpush1.msra.mxu1 %v251_v57  ;;  %525 = vmatprep.subr.mxu0 %v186_v58  ;;  %v284_v57 = vld [vmem:[#allocation2 + $0x758] sm:$0xff]  ;;  %v48_v58 = vld [vmem:[%s1314_s0 + $0x8] sm:$0xff] }
  0x68   :  { %596 = vmatprep.subr.mxu1 %v250_v59  ;;  %526 = vmatpush1.msra.mxu0 %v185_v60  ;;  %v219_v59 = vld [vmem:[#allocation2 + $0x550] sm:$0xff] }
  0x69   :  { %597 = vmatpush1.msra.mxu1 %v249_v61  ;;  %527 = vmatprep.subr.mxu0 %v184_v62  ;;  %v283_v60 = vld [vmem:[#allocation2 + $0x750] sm:$0xff]  ;;  %v218_v61 = vld [vmem:[#allocation2 + $0x548] sm:$0xff] }
  0x6a   :  { %598 = vmatprep.subr.mxu1 %v248_v63  ;;  %528 = vmatpush1.msra.mxu0 %v183_v0  ;;  %v282_v62 = vld [vmem:[#allocation2 + $0x748] sm:$0xff]  ;;  %v217_v63 = vld [vmem:[#allocation2 + $0x540] sm:$0xff] }
  0x6b   :  { %599 = vmatpush1.msra.mxu1 %v247_v1  ;;  %529 = vmatprep.subr.mxu0 %v182_v2  ;;  %v281_v0 = vld [vmem:[#allocation2 + $0x740] sm:$0xff]  ;;  %v336_v1 = vcombine.high %v48_v58, %v48_v58  ;;  %v216_v2 = vld [vmem:[#allocation2 + $0x538] sm:$0xff] }
  0x6c   :  { %600 = vmatprep.subr.mxu1 %v246_v3  ;;  %530 = vmatpush1.msra.mxu0 %v181_v4  ;;  %v280_v3 = vld [vmem:[#allocation2 + $0x738] sm:$0xff]  ;;  %v215_v4 = vld [vmem:[#allocation2 + $0x530] sm:$0xff] }
  0x6d   :  { %601 = vmatpush1.msra.mxu1 %v245_v5  ;;  %531 = vmatprep.subr.mxu0 %v180_v6  ;;  %v279_v5 = vld [vmem:[#allocation2 + $0x730] sm:$0xff]  ;;  %v214_v6 = vld [vmem:[#allocation2 + $0x528] sm:$0xff] }
  0x6e   :  { %602 = vmatprep.subr.mxu1 %v244_v7  ;;  %532 = vmatpush1.msra.mxu0 %v179_v8  ;;  %v278_v7 = vld [vmem:[#allocation2 + $0x728] sm:$0xff]  ;;  %v343_v8 = vrot.slane %v48_v58, %v1159_v52 }
  0x6f   :  { %603 = vmatpush1.msra.mxu1 %v243_v9  ;;  %533 = vmatprep.subr.mxu0 %v178_v10  ;;  %v213_v9 = vld [vmem:[#allocation2 + $0x520] sm:$0xff]  ;;  %v762_v58 = vld [vmem:[%s1319_s5 + $0x28] sm:$0xff] }
  0x70   :  { %604 = vmatprep.subr.mxu1 %v242_v11  ;;  %534 = vmatpush1.msra.mxu0 %v177_v12  ;;  %v277_v10 = vld [vmem:[#allocation2 + $0x720] sm:$0xff]  ;;  %v350_v11 = vrot.slane %v336_v1, %v1159_v52  ;;  %v212_v12 = vld [vmem:[#allocation2 + $0x518] sm:$0xff] }
  0x71   :  { %605 = vmatpush1.msra.mxu1 %v241_v13  ;;  %535 = vmatprep.subr.mxu0 %v240_v14  ;;  %v276_v13 = vld [vmem:[#allocation2 + $0x718] sm:$0xff]  ;;  %v211_v14 = vld [vmem:[#allocation2 + $0x510] sm:$0xff]  ;;  %v273_v52 = vld [vmem:[#allocation2 + $0x700] sm:$0xff] }
  0x72   :  { %606 = vmatprep.subr.mxu1 %v304_v15  ;;  %536 = vmatpush2.msra.mxu0 %v239_v16  ;;  %v275_v15 = vld [vmem:[#allocation2 + $0x710] sm:$0xff]  ;;  %v210_v16 = vld [vmem:[#allocation2 + $0x508] sm:$0xff] }
  0x73   :  { %607 = vmatpush2.msra.mxu1 %v303_v17  ;;  %537 = vmatprep.subr.mxu0 %v238_v18  ;;  %v274_v17 = vld [vmem:[#allocation2 + $0x708] sm:$0xff]  ;;  %v351_v18 = vcombine.high %v343_v8, %v343_v8 }
  0x74   :  { %608 = vmatprep.subr.mxu1 %v302_v19  ;;  %538 = vmatpush2.msra.mxu0 %v237_v20  ;;  %v209_v19 = vld [vmem:[#allocation2 + $0x500] sm:$0xff]  ;;  %v352_v20 = vcombine.high %v350_v11, %v350_v11 }
  0x75   :  { %609 = vmatpush2.msra.mxu1 %v301_v21  ;;  %539 = vmatprep.subr.mxu0 %v236_v22  ;;  %v678_v21 = vld [vmem:[%s1317_s3 + $0xf8] sm:$0xff] }
  0x76   :  { %610 = vmatprep.subr.mxu1 %v300_v23  ;;  %540 = vmatpush2.msra.mxu0 %v235_v24  ;;  %v662_v22 = vld [vmem:[%s1317_s3 + $0x78] sm:$0xff]  ;;  %v677_v23 = vld [vmem:[%s1317_s3 + $0xf0] sm:$0xff] }
  0x77   :  { %611 = vmatpush2.msra.mxu1 %v299_v25  ;;  %541 = vmatprep.subr.mxu0 %v234_v26  ;;  %v661_v24 = vld [vmem:[%s1317_s3 + $0x70] sm:$0xff]  ;;  %v676_v25 = vld [vmem:[%s1317_s3 + $0xe8] sm:$0xff] }
  0x78   :  { %612 = vmatprep.subr.mxu1 %v298_v27  ;;  %542 = vmatpush2.msra.mxu0 %v233_v28  ;;  %v660_v26 = vld [vmem:[%s1317_s3 + $0x68] sm:$0xff]  ;;  %v675_v27 = vld [vmem:[%s1317_s3 + $0xe0] sm:$0xff] }
  0x79   :  { %613 = vmatpush2.msra.mxu1 %v297_v29  ;;  %543 = vmatprep.subr.mxu0 %v232_v30  ;;  %v659_v28 = vld [vmem:[%s1317_s3 + $0x60] sm:$0xff]  ;;  %v674_v29 = vld [vmem:[%s1317_s3 + $0xd8] sm:$0xff] }
  0x7a   :  { %614 = vmatprep.subr.mxu1 %v296_v31  ;;  %544 = vmatpush2.msra.mxu0 %v231_v32  ;;  %v658_v30 = vld [vmem:[%s1317_s3 + $0x58] sm:$0xff]  ;;  %v673_v31 = vld [vmem:[%s1317_s3 + $0xd0] sm:$0xff] }
  0x7b   :  { %615 = vmatpush2.msra.mxu1 %v295_v33  ;;  %545 = vmatprep.subr.mxu0 %v230_v34  ;;  %v657_v32 = vld [vmem:[%s1317_s3 + $0x50] sm:$0xff]  ;;  %v672_v33 = vld [vmem:[%s1317_s3 + $0xc8] sm:$0xff] }
  0x7c   :  { %616 = vmatprep.subr.mxu1 %v294_v35  ;;  %546 = vmatpush2.msra.mxu0 %v229_v36  ;;  %v656_v34 = vld [vmem:[%s1317_s3 + $0x48] sm:$0xff]  ;;  %v671_v35 = vld [vmem:[%s1317_s3 + $0xc0] sm:$0xff] }
  0x7d   :  { %617 = vmatpush2.msra.mxu1 %v293_v37  ;;  %547 = vmatprep.subr.mxu0 %v228_v38  ;;  %v655_v36 = vld [vmem:[%s1317_s3 + $0x40] sm:$0xff]  ;;  %v670_v37 = vld [vmem:[%s1317_s3 + $0xb8] sm:$0xff] }
  0x7e   :  { %618 = vmatprep.subr.mxu1 %v292_v39  ;;  %548 = vmatpush2.msra.mxu0 %v227_v40  ;;  %v654_v38 = vld [vmem:[%s1317_s3 + $0x38] sm:$0xff]  ;;  %v669_v39 = vld [vmem:[%s1317_s3 + $0xb0] sm:$0xff] }
  0x7f   :  { %619 = vmatpush2.msra.mxu1 %v291_v42  ;;  %549 = vmatprep.subr.mxu0 %v226_v43  ;;  %v653_v40 = vld [vmem:[%s1317_s3 + $0x30] sm:$0xff]  ;;  %v668_v42 = vld [vmem:[%s1317_s3 + $0xa8] sm:$0xff] }
  0x80   :  { %620 = vmatprep.subr.mxu1 %v290_v44  ;;  %550 = vmatpush2.msra.mxu0 %v225_v45  ;;  %v652_v43 = vld [vmem:[%s1317_s3 + $0x28] sm:$0xff]  ;;  %v667_v44 = vld [vmem:[%s1317_s3 + $0xa0] sm:$0xff] }
  0x81   :  { %621 = vmatpush2.msra.mxu1 %v289_v46  ;;  %551 = vmatprep.subr.mxu0 %v224_v47  ;;  %v651_v45 = vld [vmem:[%s1317_s3 + $0x20] sm:$0xff]  ;;  %v666_v46 = vld [vmem:[%s1317_s3 + $0x98] sm:$0xff] }
  0x82   :  { %622 = vmatprep.subr.mxu1 %v288_v48  ;;  %552 = vmatpush2.msra.mxu0 %v223_v49  ;;  %v650_v47 = vld [vmem:[%s1317_s3 + $0x18] sm:$0xff]  ;;  %v665_v48 = vld [vmem:[%s1317_s3 + $0x90] sm:$0xff] }
  0x83   :  { %623 = vmatpush2.msra.mxu1 %v287_v50  ;;  %553 = vmatprep.subr.mxu0 %v222_v51  ;;  %v649_v49 = vld [vmem:[%s1317_s3 + $0x10] sm:$0xff]  ;;  %v664_v50 = vld [vmem:[%s1317_s3 + $0x88] sm:$0xff] }
  0x84   :  { %624 = vmatprep.subr.mxu1 %v286_v53  ;;  %554 = vmatpush2.msra.mxu0 %v221_v54  ;;  %v648_v51 = vld [vmem:[%s1317_s3 + $0x8] sm:$0xff]  ;;  %v663_v53 = vld [vmem:[%s1317_s3 + $0x80] sm:$0xff] }
  0x85   :  { %625 = vmatpush2.msra.mxu1 %v285_v55  ;;  %555 = vmatprep.subr.mxu0 %v220_v56  ;;  %v647_v54 = vld [vmem:[%s1317_s3] sm:$0xff]  ;;  %v764_v55 = vld [vmem:[%s1319_s5 + $0x38] sm:$0xff]  ;;  %v1097_v56 = vmov 0.0  }
  0x86   :  { %626 = vmatprep.subr.mxu1 %v284_v57  ;;  %556 = vmatpush2.msra.mxu0 %v219_v59  ;;  %v763_v57 = vld [vmem:[%s1319_s5 + $0x30] sm:$0xff]  ;;  %v309_v59 = vsub.s32 0, %v1153_v41 }
  0x87   :  { %627 = vmatpush2.msra.mxu1 %v283_v60  ;;  %557 = vmatprep.subr.mxu0 %v218_v61  ;;  %v305_v60 = vld [vmem:[%s1316_s2] sm:$0x3]  ;;  %v313_v61 = vsub.s32 1, %v1153_v41 }
  0x88   :  { %628 = vmatprep.subr.mxu1 %v282_v62  ;;  %558 = vmatpush2.msra.mxu0 %v217_v63  ;;  %v310_v63 = vrot.slane %v305_v60, %v309_v59 }
  0x89   :  { %629 = vmatpush2.msra.mxu1 %v281_v0  ;;  %559 = vmatprep.subr.mxu0 %v216_v2  ;;  %v314_v0 = vrot.slane %v305_v60, %v313_v61 }
  0x8a   :  { %630 = vmatprep.subr.mxu1 %v280_v3  ;;  %560 = vmatpush2.msra.mxu0 %v215_v4 }
  0x8b   :  { %631 = vmatpush2.msra.mxu1 %v279_v5  ;;  %561 = vmatprep.subr.mxu0 %v214_v6 }
  0x8c   :  { %632 = vmatprep.subr.mxu1 %v278_v7  ;;  %562 = vmatpush2.msra.mxu0 %v213_v9 }
  0x8d   :  { %633 = vmatpush2.msra.mxu1 %v277_v10  ;;  %563 = vmatprep.subr.mxu0 %v212_v12 }
  0x8e   :  { %634 = vmatprep.subr.mxu1 %v276_v13  ;;  %564 = vmatpush2.msra.mxu0 %v211_v14 }
  0x8f   :  { %635 = vmatpush2.msra.mxu1 %v275_v15  ;;  %565 = vmatprep.subr.mxu0 %v210_v16 }
  0x90   :  { %636 = vmatprep.subr.mxu1 %v274_v17  ;;  %566 = vmatpush2.msra.mxu0 %v209_v19  ;;  %v761_v17 = vld [vmem:[%s1319_s5 + $0x20] sm:$0xff]  ;;  %v759_v19 = vld [vmem:[%s1319_s5 + $0x10] sm:$0xff] }
  0x91   :  { %567 = vmatprep.mubr.f32.mxu0 %v351_v18  ;;  %637 = vmatpush2.msra.mxu1 %v273_v52  ;;  %v760_v18 = vld [vmem:[%s1319_s5 + $0x18] sm:$0xff]  ;;  %v757_v52 = vld [vmem:[%s1319_s5] sm:$0xff] }
  0x92   :  { %638 = vmatprep.mubr.f32.mxu1 %v352_v20  ;;  %568 = vmatmul.mubr.f32.vlgmr.msra.gmra.mxu0 %v343_v8  ;;  %v758_v20 = vld [vmem:[%s1319_s5 + $0x8] sm:$0xff] }
  0x93   :  { %639 = vmatmul.mubr.f32.vlgmr.msra.gmra.mxu1 %v350_v11  ;;  %963 = vmatprep.subr.mxu0 %v678_v21 }
  0x94   :  { %964 = vmatpush3.msra.mxu0 %v662_v22  ;;  %1010 = vmatprep.subr.mxu1 %v1097_v56  ;;  %v958_v22 = vld [vmem:[%s1318_s4] ss:$0 sm:$0xff] }
  0x95   :  { %965 = vmatprep.subr.mxu0 %v677_v23  ;;  %1011 = vmatpush3.msra.mxu1 %v764_v55 }
  0x96   :  { %966 = vmatpush3.msra.mxu0 %v661_v24  ;;  %1012 = vmatprep.subr.mxu1 %v1097_v56 }
  0x97   :  { %967 = vmatprep.subr.mxu0 %v676_v25  ;;  %1013 = vmatpush3.msra.mxu1 %v763_v57 }
  0x98   :  { %968 = vmatpush3.msra.mxu0 %v660_v26  ;;  %1014 = vmatprep.subr.mxu1 %v1097_v56 }
  0x99   :  { %969 = vmatprep.subr.mxu0 %v675_v27  ;;  %1015 = vmatpush3.msra.mxu1 %v762_v58  ;;  %v848_v27 = vld [vmem:[%s1321_s7 + $0x8] sm:$0xff] }
  0x9a   :  { %970 = vmatpush3.msra.mxu0 %v659_v28  ;;  %1016 = vmatprep.subr.mxu1 %v1097_v56  ;;  %v847_v28 = vld [vmem:[%s1321_s7] sm:$0xff] }
  0x9b   :  { %971 = vmatprep.subr.mxu0 %v674_v29  ;;  %1017 = vmatpush3.msra.mxu1 %v761_v17  ;;  %v959_v29 = vld [vmem:[%s1320_s6] ss:$0 sm:$0xff]  ;;  %s1099_s6 = smov [#allocation5]  }
  0x9c   :  { %972 = vmatpush3.msra.mxu0 %v658_v30  ;;  %1018 = vmatprep.subr.mxu1 %v1097_v56  ;;  %s949_s7 = sshll.u32 %s1099_s6, 4  ;;  %s950_s7 = int_to_ptr.vmem [resolvable:$true] %s949_s7 }
  0x9d   :  { %973 = vmatprep.subr.mxu0 %v673_v31  ;;  %1019 = vmatpush3.msra.mxu1 %v760_v18  ;;  %p1074_p6 = scmp.lt.s32.totalorder %s950_s7, %s950_s7 }
  0x9e   :  { %974 = vmatpush3.msra.mxu0 %v657_v32  ;;  %1020 = vmatprep.subr.mxu1 %v1097_v56 }
  0x9f   :  { %975 = vmatprep.subr.mxu0 %v672_v33  ;;  %1021 = vmatpush3.msra.mxu1 %v759_v19 }
  0xa0   :  { %976 = vmatpush3.msra.mxu0 %v656_v34  ;;  %1022 = vmatprep.subr.mxu1 %v1097_v56  ;;  %v961_v34 = vld [vmem:[%s1322_s8] ss:$0 sm:$0xff]  ;;  %s1069_s8 = scalar_lea.vmem %s950_s7, 32 }
  0xa1   :  { %977 = vmatprep.subr.mxu0 %v671_v35  ;;  %1023 = vmatpush3.msra.mxu1 %v758_v20  ;;  %p1070_p5 = scmp.ne.s32.totalorder %s950_s7, %s1069_s8  ;;  %p1075_p7 = scmp.lt.s32.totalorder %s1069_s8, %s1069_s8 }
  0xa2   :  { %978 = vmatpush3.msra.mxu0 %v655_v36  ;;  %1024 = vmatprep.subr.mxu1 %v1097_v56 }
  0xa3   :  { %979 = vmatprep.subr.mxu0 %v670_v37  ;;  %1025 = vmatpush3.msra.mxu1 %v757_v52  ;;  %p1076_p8 = por %p1075_p7, %p1074_p6 }
  0xa4   :  { %980 = vmatpush3.msra.mxu0 %v654_v38  ;;  %1026 = vmatprep.mubr.msk.f32.mxu1 %vm1098_vm0, %v1097_v56 }
  0xa5   :  { %981 = vmatprep.subr.mxu0 %v669_v39  ;;  %1029 = vmatprep.subr.mxu1 %v1097_v56  ;;  %p1077_p9 = pnand %p1076_p8, %p1070_p5 }
  0xa6   :  { %982 = vmatpush3.msra.mxu0 %v653_v40 }
  0xa7   :  { %983 = vmatprep.subr.mxu0 %v668_v42 }
  0xa8   :  { %984 = vmatpush3.msra.mxu0 %v652_v43 }
  0xa9   :  { %985 = vmatprep.subr.mxu0 %v667_v44 }
  0xaa   :  { %986 = vmatpush3.msra.mxu0 %v651_v45 }
  0xab   :  { %987 = vmatprep.subr.mxu0 %v666_v46 }
  0xac   :  { %988 = vmatpush3.msra.mxu0 %v650_v47 }
  0xad   :  { %989 = vmatprep.subr.mxu0 %v665_v48 }
  0xae   :  { %990 = vmatpush3.msra.mxu0 %v649_v49 }
  0xaf   :  { %991 = vmatprep.subr.mxu0 %v664_v50 }
  0xb0   :  { %992 = vmatpush3.msra.mxu0 %v648_v51 }
  0xb1   :  { %993 = vmatprep.subr.mxu0 %v663_v53 }
  0xb2   :  { %994 = vmatpush3.msra.mxu0 %v647_v54 }
 0x110   :  { %v427_v62 = vpop.f32.mrf.mxu0 }
 0x111   :  { %v428_v3 = vadd.f32 %v427_v62, %v310_v63 }
 0x112   :  { %v498_v1 = vpop.f32.mrf.mxu1  ;;  %v429_v2 = vpop.f32.mrf.mxu0 }
 0x113   :  { %v430_v4 = vadd.f32 %v429_v2, %v314_v0  ;;  %v499_v6 = vadd.f32 %v498_v1, %v428_v3 }
 0x114   :  { %v500_v5 = vpop.f32.mrf.mxu1 }
 0x115   :  { %v501_v9 = vadd.f32 %v500_v5, %v430_v4 }
 0x152   :  { %v569_v7 = vpop.f32.mrf.mxu0 }
 0x153   :  { %v640_v8 = vpop.f32.mrf.mxu1  ;;  %v570_v10 = vadd.f32 %v569_v7, %v499_v6 }
 0x154   :  { %v571_v11 = vpop.f32.mrf.mxu0 }
 0x155   :  { %v572_v12 = vadd.f32 %v571_v11, %v501_v9  ;;  %v641_v13 = vadd.f32 %v640_v8, %v570_v10  ;;  %v642_v14 = vpop.f32.mrf.mxu1 }
 0x157   :  { %v643_v15 = vadd.f32 %v642_v14, %v572_v12  ;;  %v645_v41 = vmax.f32 %v641_v13, 0.0 }
 0x159   :  { %v646_v16 = vmax.f32 %v643_v15, 0.0 }
 0x15b   :  { %750 = vmatprep.mubr.f32.mxu0 %v646_v16 }
 0x15c   :  { %751 = vmatmul.mubr.f32.vlgmr.msra.gmra.mxu0 %v645_v41 }
 0x21c   :  { %v995_v21 = vpop.f32.mrf.mxu0 }
 0x21e   :  { %v996_v23 = vpop.f32.mrf.mxu0 }
 0x21f   :  { %v997_v24 = vadd.f32 %v996_v23, %v995_v21 }
 0x221   :  { %v753_v25 = vadd.f32 %v997_v24, %v958_v22 }
 0x223   :  { %v756_v26 = vmax.f32 %v753_v25, 0.0 }
 0x225   :  { %1027 = vmatmul.mubr.msk.f32.vlgmr.msra.gmra.mxu1 %vm772_vm1, %v756_v26 }
 0x226   :  { %1033 = vmatprep.mubr.msk.f32.mxu1 %vm1098_vm0, %v1097_v56  ;;  %1030 = vmatpush3.msra.mxu1 %v848_v27 }
 0x227   :  { %1031 = vmatprep.subr.mxu1 %v1097_v56 }
 0x228   :  { %1032 = vmatpush3.msra.mxu1 %v847_v28 }
 0x2e5   :  { %v842_v30 = vpop.f32.mrf.mxu1 }
 0x2e6   :  { %v843_v31 = vadd.f32 %v959_v29, %v842_v30 }
 0x2e7   :  { %v1028_v32 = vpop.f32.mrf.mxu1 }
 0x2e8   :  { %v846_v33 = vmax.f32 %v843_v31, 0.0 }
 0x2ea   :  { %1034 = vmatmul.mubr.msk.f32.vlgmr.msra.gmra.mxu1 %vm856_vm2, %v846_v33 }
 0x3aa   :  { %v926_v35 = vpop.f32.mrf.mxu1 }
 0x3ab   :  { %v927_v36 = vadd.f32 %v961_v34, %v926_v35 }
 0x3ac   :  { %v1035_v37 = vpop.f32.mrf.mxu1 }
 0x3ad   :  { %v931_v38 = vsel %vm930_vm3, %v927_v36, -inf }
 0x3ae   :  { %932 = vmax.xlane.f32.xlu0 %v931_v38 }
 0x437   :  { %v933_v39 = vpop.xlane.xlu0 %932 }
 0x438   :  { %v934_v40 = vsub.f32 %v927_v36, %v933_v39 }
 0x43a   :  { %v935_v42 = vmul.f32 1.442695, %v934_v40 }
 0x43c   :  { %1045 = vpow2.f32 %v935_v42 }
 0x449   :  { %v1046_v43 = vpop.eup %1045 }
 0x44a   :  { %v937_v44 = vsel %vm930_vm3, %v1046_v43, 0.0 }
 0x44b   :  { %938 = vadd.xlane.f32.xlu0 %v937_v44 }
 0x4d4   :  { %v939_v45 = vpop.xlane.xlu0 %938 }
 0x4d5   :  { %1047 = vrcp.f32 %v939_v45 }
 0x4e2   :  { %v1048_v46 = vpop.eup %1047 }
 0x4e3   :  { %v941_v47 = vmul.f32 %v1048_v46, %v1046_v43 }
 0x4e5   :  { %942 = vst.msk [vmem:[#allocation5] sm:$0x3] %vm930_vm3, %v941_v47 }
 0x4e6   :  { %1080 = shalt.err (!%p1077_p9)
}
 0x4e7   :  { %952 = dma.vmem_to_hbm [thread:$0]  %s950_s7, 32, %s1323_s9, [#allocation4]  }
 0x4e8   :  { %1091 = dma.done.wait [#allocation4], 32  }
 0x4e9   :  { %1092 = vsyncadd [#allocation4], 4294967264 }
 0x4ea   :  { %956 = vsyncpa [#allocation3], 1 }
 0x4eb   :  { %957 = vsyncpa [#allocation4], 1 }

</bundles_post_ra>
